<compile_context>
chip_gen: v6e
topology: v6e:2x2x1
jax: 0.10.0
libtpu: 0.0.40
codegen_flags: <defaults>
</compile_context>

<pallas_src>
import functools

import jax
import jax.numpy as jnp
from jax import lax
from jax.experimental import pallas as pl
from jax.experimental.pallas import tpu as pltpu


# ---------------------------------------------------------------------------
# Kernel 1: ColBERT late-interaction score tiles
# ---------------------------------------------------------------------------
def _score_tile(doc_blk, qT, sel):
    """(Tc, B) tile of the TRANSPOSED score matrix for one block of Tc docs.

    tile[t, b] = sum_n max_s <q[b, n, :], doc[c0 + t, s, :]>
    """
    Tc, Ns, D = doc_blk.shape
    n_cols = qT.shape[-1]                                    # B * Nq
    dt = doc_blk.reshape(Tc * Ns, D)                         # free leading-dim merge (Ns % 8 == 0)
    # One wide MXU matmul per grid step: (Tc*Ns, D) x (D, B*Nq), bf16 in / f32 accumulate.
    s = jnp.dot(dt, qT, preferred_element_type=jnp.float32)  # (Tc*Ns, B*Nq)
    # Max over doc tokens: leading-dim split is layout-free, reduce runs on sublanes.
    m = jnp.max(s.reshape(Tc, Ns, n_cols), axis=1)           # (Tc, B*Nq)
    # Sum over the Nq tokens of each query: grouped lane-sum expressed as a tiny f32
    # matmul with a 0/1 block-diagonal selector (keeps the XLU free).
    return jnp.dot(m, sel, preferred_element_type=jnp.float32)   # (Tc, B)


def _scores_train_kernel(qT_ref, d_ref, tqT_ref, td_ref, sel_ref, s_out_ref, t_out_ref):
    sel = sel_ref[...]
    s_out_ref[...] = _score_tile(d_ref[...], qT_ref[...], sel)[None]
    t_out_ref[...] = _score_tile(td_ref[...], tqT_ref[...], sel)[None]


def _scores_eval_kernel(qT_ref, d_ref, sel_ref, s_out_ref):
    s_out_ref[...] = _score_tile(d_ref[...], qT_ref[...], sel_ref[...])[None]


# ---------------------------------------------------------------------------
# Kernel 2: O(B^2) loss epilogue
# ---------------------------------------------------------------------------
def _softplus(x):
    # Numerically stable softplus using only exp/log (Mosaic-friendly).
    return jnp.maximum(x, 0.0) + jnp.log(1.0 + jnp.exp(-jnp.abs(x)))


def _contrastive_from_scores_t(st):
    """Contrastive term from transposed scores st[c, b] = scores[b, c] -> (1, 1)."""
    B = st.shape[0]
    r = lax.broadcasted_iota(jnp.int32, (B, B), 0)
    c = lax.broadcasted_iota(jnp.int32, (B, B), 1)
    eye = r == c
    pos = jnp.sum(jnp.where(eye, st, 0.0), axis=0, keepdims=True)        # (1, B)
    neg = jnp.max(jnp.where(eye, -jnp.inf, st), axis=0, keepdims=True)   # (1, B)
    return jnp.sum(_softplus(neg - pos), axis=1, keepdims=True) / B      # (1, 1)


def _log_softmax_cols(z):
    z = z - jnp.max(z, axis=0, keepdims=True)
    return z - jnp.log(jnp.sum(jnp.exp(z), axis=0, keepdims=True))


def _epilogue_train_kernel(st_ref, tt_ref, out_ref, *, alpha, temperature):
    st = st_ref[...]
    tt = tt_ref[...]
    B = st.shape[0]
    contrastive = _contrastive_from_scores_t(st)
    inv_t = 1.0 / temperature                                            # folded statically
    # student log_softmax over docs == over axis 0 of the transposed matrix
    s_logp = _log_softmax_cols(st * inv_t)
    # Exact teacher log-softmax, tp = exp(log_tp): no approx reciprocal in the KL path.
    t_logp = _log_softmax_cols(tt * inv_t)
    tp = jnp.exp(t_logp)
    # nn.KLDivLoss(reduction='batchmean', log_target=False)
    kl_mat = tp * (t_logp - s_logp)
    kl = jnp.sum(jnp.sum(kl_mat, axis=1, keepdims=True), axis=0, keepdims=True) / B
    out_ref[...] = contrastive + (alpha * temperature * temperature) * kl


def _epilogue_eval_kernel(st_ref, out_ref):
    out_ref[...] = _contrastive_from_scores_t(st_ref[...])


# ---------------------------------------------------------------------------
# Wrapper
# ---------------------------------------------------------------------------
def _choose_block_c(B, Ns, n_cols, *, target_lanes=512, max_interm_bytes=4 << 20):
    """Largest divisor of B such that Tc*Ns reaches ~target MXU width while keeping the
    per-step f32 matmul intermediate under max_interm_bytes (v7x VMEM safety)."""
    best = 1
    for tc in range(1, B + 1):
        if B % tc != 0:
            continue
        if tc > 1 and tc * Ns * n_cols * 4 > max_interm_bytes:
            break
        best = tc
        if tc * Ns >= target_lanes:
            break
    return best


def colbert_pairwise_distill_kl_loss(query_embeddings, doc_embeddings,
                                     teacher_query_outputs=None,
                                     teacher_doc_outputs=None,
                                     eval=False, alpha=0.5, temperature=1.0,
                                     block_c=None, compute_dtype=jnp.bfloat16):
    """JAX/Pallas equivalent of ColBertPairwiseDistillKLLoss.forward."""
    B, Nq, D = query_embeddings.shape
    Bc, Ns, Dc = doc_embeddings.shape
    assert B == Bc, f'Batch size mismatch: {B} vs {Bc}'
    assert D == Dc, f'Embedding dimension mismatch: {D} vs {Dc}'

    n_cols = B * Nq
    Tc = int(block_c) if block_c is not None else _choose_block_c(B, Ns, n_cols)
    assert B % Tc == 0, f'block_c={Tc} must divide batch size {B}'
    n_steps = B // Tc
    n_streams = 1 if eval else 2
    itemsize = jnp.dtype(compute_dtype).itemsize

    # bf16 matmul operands (halves DMA bytes, native MXU path); accumulation stays f32.
    q = query_embeddings.astype(compute_dtype)
    docs = doc_embeddings.astype(compute_dtype)
    # Queries pre-transposed once in XLA -> plain (M,K)x(K,N) contraction in the kernel
    # (no per-step RHS transpose on the XLU); the slab stays resident across the grid.
    qT = q.reshape(n_cols, D).T
    # 0/1 block-diagonal selector used for the per-query token sum (tiny MXU matmul).
    sel = (jnp.arange(n_cols, dtype=jnp.int32)[:, None] // Nq
           == jnp.arange(B, dtype=jnp.int32)[None, :]).astype(jnp.float32)

    qT_spec = pl.BlockSpec((D, n_cols), lambda c: (0, 0))      # resident across the grid
    d_spec = pl.BlockSpec((Tc, Ns, D), lambda c: (c, 0, 0))    # streamed, double-buffered
    sel_spec = pl.BlockSpec((n_cols, B), lambda c: (0, 0))     # resident
    out_spec = pl.BlockSpec((1, Tc, B), lambda c: (c, 0, 0))
    out_sds = jax.ShapeDtypeStruct((n_steps, Tc, B), jnp.float32)

    # Explicit VMEM budget from the actual footprint (no hard-coded 48 MiB).
    resident = n_streams * D * n_cols * itemsize * 2 + n_cols * B * 4 * 2
    streamed = n_streams * Tc * Ns * D * itemsize * 2
    outbufs = n_streams * Tc * B * 4 * 2
    interm = Tc * Ns * n_cols * 4 * 2
    vmem_bytes = int(min(96 << 20, max(16 << 20, 2 * (resident + streamed + outbufs + interm))))

    compiler_params = pltpu.CompilerParams(
        # No whole-grid scratch / epilogue in this kernel, so the doc-column axis is
        # truly independent -> "parallel" lets v7x shard it across both TensorCores.
        dimension_semantics=("parallel",),
        vmem_limit_bytes=vmem_bytes,
    )
    cost = pl.CostEstimate(
        flops=int(2 * n_streams * B * B * Nq * Ns * D),
        transcendentals=0,
        bytes_accessed=int(n_streams * (B * Nq * D + B * Ns * D) * itemsize
                           + n_cols * B * 4 + n_streams * B * B * 4),
    )

    # TODO(synk): padded-token masking (typical ColBERT batching) is out of scope; inputs
    # are assumed dense/unpadded, matching the reference PyTorch module.

    if eval:
        s_tiles = pl.pallas_call(
            _scores_eval_kernel,
            out_shape=out_sds,
            grid=(n_steps,),
            in_specs=[qT_spec, d_spec, sel_spec],
            out_specs=out_spec,
            compiler_params=compiler_params,
            cost_estimate=cost,
        )(qT, docs, sel)
        sT = s_tiles.reshape(B, B)              # sT[c, b] = scores[b, c]
        loss = pl.pallas_call(
            _epilogue_eval_kernel,
            out_shape=jax.ShapeDtypeStruct((1, 1), jnp.float32),
        )(sT)
        return loss[0, 0]

    assert teacher_query_outputs is not None and teacher_doc_outputs is not None, \
        'Teacher outputs must be provided when eval=False'
    assert teacher_query_outputs.shape == (B, Nq, D)
    assert teacher_doc_outputs.shape == (B, Ns, D)
    tq = teacher_query_outputs.astype(compute_dtype)
    tdocs = teacher_doc_outputs.astype(compute_dtype)
    tqT = tq.reshape(n_cols, D).T

    s_tiles, t_tiles = pl.pallas_call(
        _scores_train_kernel,
        out_shape=(out_sds, out_sds),
        grid=(n_steps,),
        in_specs=[qT_spec, d_spec, qT_spec, d_spec, sel_spec],
        out_specs=(out_spec, out_spec),
        compiler_params=compiler_params,
        cost_estimate=cost,
    )(qT, docs, tqT, tdocs, sel)
    sT = s_tiles.reshape(B, B)                  # sT[c, b] = scores[b, c]
    tT = t_tiles.reshape(B, B)

    loss = pl.pallas_call(
        functools.partial(_epilogue_train_kernel,
                          alpha=float(alpha), temperature=float(temperature)),
        out_shape=jax.ShapeDtypeStruct((1, 1), jnp.float32),
    )(sT, tT)
    return loss[0, 0]


# ---------------------------------------------------------------------------
# Pure-JAX reference (mirrors the PyTorch forward) for verification
# ---------------------------------------------------------------------------
def _reference_loss(q, d, tq, td, alpha=0.5, temperature=1.0):
    scores = jnp.einsum('bnd,csd->bcns', q, d).max(axis=3).sum(axis=2)
    pos = jnp.diag(scores)
    eye = jnp.eye(scores.shape[0], dtype=bool)
    neg = jnp.where(eye, -jnp.inf, scores).max(axis=1)
    contrastive = jnp.mean(jax.nn.softplus(neg - pos))
    tscores = jnp.einsum('bnd,csd->bcns', tq, td).max(axis=3).sum(axis=2)
    logp = jax.nn.log_softmax(scores / temperature, axis=1)
    tlogp = jax.nn.log_softmax(tscores / temperature, axis=1)
    tp = jnp.exp(tlogp)
    kl = jnp.sum(tp * (tlogp - logp)) / scores.shape[0]
    return contrastive + alpha * kl * temperature ** 2


def _reference_contrastive(q, d):
    scores = jnp.einsum('bnd,csd->bcns', q, d).max(axis=3).sum(axis=2)
    pos = jnp.diag(scores)
    eye = jnp.eye(scores.shape[0], dtype=bool)
    neg = jnp.where(eye, -jnp.inf, scores).max(axis=1)
    return jnp.mean(jax.nn.softplus(neg - pos))


if __name__ == "__main__":
    key = jax.random.PRNGKey(0)
    k1, k2, k3, k4 = jax.random.split(key, 4)

    B, Nq, Ns, D = 4, 8, 16, 32
    alpha, temperature = 0.5, 2.0

    # Pre-round inputs to bf16 so the bf16-MXU kernel and the f32 reference see identical
    # values (bf16 products are exact in f32 -> only accumulation-order differences remain).
    def rnd(k, shape):
        return jax.random.normal(k, shape, dtype=jnp.float32).astype(jnp.bfloat16).astype(jnp.float32)

    q = rnd(k1, (B, Nq, D))
    d = rnd(k2, (B, Ns, D))
    tq = rnd(k3, (B, Nq, D))
    td = rnd(k4, (B, Ns, D))

    # Training path (contrastive + KL distillation). block_c=2 -> grid of 2 steps so the
    # doc-streaming pipeline is actually exercised at these toy shapes.
    loss = colbert_pairwise_distill_kl_loss(q, d, tq, td, eval=False,
                                            alpha=alpha, temperature=temperature,
                                            block_c=2)
    loss = jax.block_until_ready(loss)
    ref = jax.block_until_ready(_reference_loss(q, d, tq, td, alpha=alpha, temperature=temperature))
    assert abs(float(loss) - float(ref)) <= 2e-3 * max(1.0, abs(float(ref))), (float(loss), float(ref))

    # Eval path (contrastive only), auto-selected doc-column block.
    loss_eval = colbert_pairwise_distill_kl_loss(q, d, eval=True)
    loss_eval = jax.block_until_ready(loss_eval)
    ref_eval = jax.block_until_ready(_reference_contrastive(q, d))
    assert abs(float(loss_eval) - float(ref_eval)) <= 2e-3 * max(1.0, abs(float(ref_eval))), \
        (float(loss_eval), float(ref_eval))

    print("KERNEL_OK")
</pallas_src>

<mosaic_0001>
module attributes {stable_mosaic.version = 11 : i64} {
  func.func @_scores_train_kernel(%arg0: i32, %arg1: memref<32x32xbf16, #tpu.memory_space<vmem>>, %arg2: memref<2x16x32xbf16, #tpu.memory_space<vmem>>, %arg3: memref<32x32xbf16, #tpu.memory_space<vmem>>, %arg4: memref<2x16x32xbf16, #tpu.memory_space<vmem>>, %arg5: memref<32x4xf32, #tpu.memory_space<vmem>>, %arg6: memref<1x2x4xf32, #tpu.memory_space<vmem>>, %arg7: memref<1x2x4xf32, #tpu.memory_space<vmem>>) attributes {dimension_semantics = [#tpu.dimension_semantics<parallel>], iteration_bounds = array<i64: 2>, scalar_prefetch = 0 : i64, scratch_operands = 0 : i64, tpu.core_type = #tpu.core_type<tc>, window_params = [{pipeline_mode = #tpu.pipeline_mode<synchronous>, transform_indices = @transform_0, window_bounds = array<i64: 32, 32>}, {transform_indices = @transform_1, window_bounds = array<i64: 2, 16, 32>}, {pipeline_mode = #tpu.pipeline_mode<synchronous>, transform_indices = @transform_2, window_bounds = array<i64: 32, 32>}, {transform_indices = @transform_3, window_bounds = array<i64: 2, 16, 32>}, {pipeline_mode = #tpu.pipeline_mode<synchronous>, transform_indices = @transform_4, window_bounds = array<i64: 32, 4>}, {transform_indices = @transform_5, window_bounds = array<i64: 1, 2, 4>}, {transform_indices = @transform_6, window_bounds = array<i64: 1, 2, 4>}]} {
    %c0 = arith.constant 0 : index
    %c0_0 = arith.constant 0 : index
    %0 = vector.load %arg5[%c0, %c0_0] : memref<32x4xf32, #tpu.memory_space<vmem>>, vector<32x4xf32>
    %c0_1 = arith.constant 0 : index
    %c0_2 = arith.constant 0 : index
    %c0_3 = arith.constant 0 : index
    %1 = vector.load %arg2[%c0_1, %c0_2, %c0_3] : memref<2x16x32xbf16, #tpu.memory_space<vmem>>, vector<2x16x32xbf16>
    %c0_4 = arith.constant 0 : index
    %c0_5 = arith.constant 0 : index
    %2 = vector.load %arg1[%c0_4, %c0_5] : memref<32x32xbf16, #tpu.memory_space<vmem>>, vector<32x32xbf16>
    %3 = vector.shape_cast %1 : vector<2x16x32xbf16> to vector<32x32xbf16>
    %cst = arith.constant dense<0.000000e+00> : vector<32x32xf32>
    %4 = tpu.matmul %3, %2, %cst {dimension_numbers = #tpu.dot_dimension_numbers<[1], [0], [0], [1], [0, 0, 1, 1], [], []>} : vector<32x32xbf16>, vector<32x32xbf16>, vector<32x32xf32> -> vector<32x32xf32>
    %5 = vector.shape_cast %4 : vector<32x32xf32> to vector<2x16x32xf32>
    %cst_6 = arith.constant dense<0xFF800000> : vector<2x32xf32>
    %6 = vector.multi_reduction <maximumf>, %5, %cst_6 [1] : vector<2x16x32xf32> to vector<2x32xf32>
    %cst_7 = arith.constant dense<0.000000e+00> : vector<2x4xf32>
    %7 = tpu.matmul %6, %0, %cst_7 {dimension_numbers = #tpu.dot_dimension_numbers<[1], [0], [0], [1], [0, 0, 1, 1], [], []>} : vector<2x32xf32>, vector<32x4xf32>, vector<2x4xf32> -> vector<2x4xf32>
    %8 = vector.shape_cast %7 : vector<2x4xf32> to vector<1x2x4xf32>
    %c0_8 = arith.constant 0 : index
    %c0_9 = arith.constant 0 : index
    %c0_10 = arith.constant 0 : index
    %9 = vector.load %arg6[%c0_8, %c0_9, %c0_10] : memref<1x2x4xf32, #tpu.memory_space<vmem>>, vector<1x2x4xf32>
    tpu.vector_store %arg6[%c0_8, %c0_9, %c0_10], %8 {strides = array<i32>} : memref<1x2x4xf32, #tpu.memory_space<vmem>>, vector<1x2x4xf32>,
    %c0_11 = arith.constant 0 : index
    %c0_12 = arith.constant 0 : index
    %c0_13 = arith.constant 0 : index
    %10 = vector.load %arg4[%c0_11, %c0_12, %c0_13] : memref<2x16x32xbf16, #tpu.memory_space<vmem>>, vector<2x16x32xbf16>
    %c0_14 = arith.constant 0 : index
    %c0_15 = arith.constant 0 : index
    %11 = vector.load %arg3[%c0_14, %c0_15] : memref<32x32xbf16, #tpu.memory_space<vmem>>, vector<32x32xbf16>
    %12 = vector.shape_cast %10 : vector<2x16x32xbf16> to vector<32x32xbf16>
    %cst_16 = arith.constant dense<0.000000e+00> : vector<32x32xf32>
    %13 = tpu.matmul %12, %11, %cst_16 {dimension_numbers = #tpu.dot_dimension_numbers<[1], [0], [0], [1], [0, 0, 1, 1], [], []>} : vector<32x32xbf16>, vector<32x32xbf16>, vector<32x32xf32> -> vector<32x32xf32>
    %14 = vector.shape_cast %13 : vector<32x32xf32> to vector<2x16x32xf32>
    %cst_17 = arith.constant dense<0xFF800000> : vector<2x32xf32>
    %15 = vector.multi_reduction <maximumf>, %14, %cst_17 [1] : vector<2x16x32xf32> to vector<2x32xf32>
    %cst_18 = arith.constant dense<0.000000e+00> : vector<2x4xf32>
    %16 = tpu.matmul %15, %0, %cst_18 {dimension_numbers = #tpu.dot_dimension_numbers<[1], [0], [0], [1], [0, 0, 1, 1], [], []>} : vector<2x32xf32>, vector<32x4xf32>, vector<2x4xf32> -> vector<2x4xf32>
    %17 = vector.shape_cast %16 : vector<2x4xf32> to vector<1x2x4xf32>
    %c0_19 = arith.constant 0 : index
    %c0_20 = arith.constant 0 : index
    %c0_21 = arith.constant 0 : index
    %18 = vector.load %arg7[%c0_19, %c0_20, %c0_21] : memref<1x2x4xf32, #tpu.memory_space<vmem>>, vector<1x2x4xf32>
    tpu.vector_store %arg7[%c0_19, %c0_20, %c0_21], %17 {strides = array<i32>} : memref<1x2x4xf32, #tpu.memory_space<vmem>>, vector<1x2x4xf32>,
    return
  }
  func.func @transform_0(%arg0: i32) -> (i32, i32) {
    %c0_i32 = arith.constant 0 : i32
    %c0_i32_0 = arith.constant 0 : i32
    %c0_i32_1 = arith.constant 0 : i32
    return %c0_i32, %c0_i32_0 : i32, i32
  }
  func.func @transform_1(%arg0: i32) -> (i32, i32, i32) {
    %c0_i32 = arith.constant 0 : i32
    %c0_i32_0 = arith.constant 0 : i32
    %c0_i32_1 = arith.constant 0 : i32
    return %arg0, %c0_i32, %c0_i32_0 : i32, i32, i32
  }
  func.func @transform_2(%arg0: i32) -> (i32, i32) {
    %c0_i32 = arith.constant 0 : i32
    %c0_i32_0 = arith.constant 0 : i32
    %c0_i32_1 = arith.constant 0 : i32
    return %c0_i32, %c0_i32_0 : i32, i32
  }
  func.func @transform_3(%arg0: i32) -> (i32, i32, i32) {
    %c0_i32 = arith.constant 0 : i32
    %c0_i32_0 = arith.constant 0 : i32
    %c0_i32_1 = arith.constant 0 : i32
    return %arg0, %c0_i32, %c0_i32_0 : i32, i32, i32
  }
  func.func @transform_4(%arg0: i32) -> (i32, i32) {
    %c0_i32 = arith.constant 0 : i32
    %c0_i32_0 = arith.constant 0 : i32
    %c0_i32_1 = arith.constant 0 : i32
    return %c0_i32, %c0_i32_0 : i32, i32
  }
  func.func @transform_5(%arg0: i32) -> (i32, i32, i32) {
    %c0_i32 = arith.constant 0 : i32
    %c0_i32_0 = arith.constant 0 : i32
    %c0_i32_1 = arith.constant 0 : i32
    return %arg0, %c0_i32, %c0_i32_0 : i32, i32, i32
  }
  func.func @transform_6(%arg0: i32) -> (i32, i32, i32) {
    %c0_i32 = arith.constant 0 : i32
    %c0_i32_0 = arith.constant 0 : i32
    %c0_i32_1 = arith.constant 0 : i32
    return %arg0, %c0_i32, %c0_i32_0 : i32, i32, i32
  }
}

</mosaic_0001>

<bundles_post_ra>
// kernel: tpu_custom_call.1
= control target key start
LH: loop header
LB: loop body
LE: loop exit
PB: predicated region body
PF: predicated region fallthrough
CT: control target
= control target key end

     0   :  { %s1564_s0 = inlined_call_operand.hbm [shape: bf16[32,32], index: 0, kind: input, shape index: {}]   ;;  %s1565_s1 = inlined_call_operand.vmem [shape: bf16[4,16,32], index: 1, kind: input, shape index: {}]   ;;  %s1566_s2 = inlined_call_operand.hbm [shape: bf16[32,32], index: 2, kind: input, shape index: {}]   ;;  %s1567_s3 = inlined_call_operand.hbm [shape: bf16[4,16,32], index: 3, kind: input, shape index: {}]   ;;  %s1568_s4 = inlined_call_operand.vmem [shape: f32[32,4], index: 4, kind: input, shape index: {}]   ;;  %s1569_s5 = inlined_call_operand.hbm [shape: f32[2,2,4], index: 5, kind: output, shape index: {0}]   ;;  %s1570_s6 = inlined_call_operand.hbm [shape: f32[2,2,4], index: 6, kind: output, shape index: {1}]  }
   0x1   :  { %1575 = sst [smem:[#allocation17_spill]] %s1564_s0 }
   0x2   :  { %12 = vsyncpa [#allocation3], 0 }
   0x3   :  { %13 = vsyncpa [#allocation6], 0 }
   0x4   :  { %14 = vsyncpa [#allocation4], 0 }
   0x5   :  { %16 = vsyncpa [#allocation4 + $0x1], 0 }
   0x6   :  { %17 = vsyncpa [#allocation10], 0 }
   0x7   :  { %19 = vsyncpa [#allocation10 + $0x1], 0  ;;  %s1275_s21 = smov 0   ;;  %s1277_s22 = smov 0  }
   0x8   :  { %s1279_s23 = smov 0   ;;  %s1281_s24 = smov 0  }
   0x9 LB: > { %s1296_s25 = sadd.s32 4294967295, %s1229_s24   ;;  %s866_s26 = sadd.s32 4294967294, %s1229_s24   ;;  %s1229_s24 = sphi %s1281_s24, %s1598_s24   ;;  %s1225_s23 = sphi %s1279_s23, %s1597_s23   ;;  %s1221_s22 = sphi %s1277_s22, %s1596_s22   ;;  %s1217_s21 = sphi %s1275_s21, %s1595_s21  }
   0xa   : > { %s1300_s27 = sadd.s32 1, %s1229_s24   ;;  %s100_s28 = sadd.s32 1, %s1225_s23 }
   0xb   : > { %s97_s29 = ssub.s32 %s1229_s24, %s1300_s27  ;;  %p107_p0 = scmp.ne.s32.totalorder %s1225_s23, %s1221_s22 }
   0xc   : > { %p98_p1 = scmp.eq.s32.totalorder %s97_s29, 0  ;;  %p108_p2 = scmp.eq.s32.totalorder %s1229_s24, 0 }
   0xd   : > { %p113_p3 = scmp.ne.s32.totalorder %s1221_s22, %s1217_s21  ;;  %p1572_p4 = scmp.eq.s32.totalorder %s1296_s25, 0 }
   0xe   : > { %s1312_s30 = scalar_select %p98_p1, %s1225_s23, %s100_s28  }
   0xf   : > { %p1314_p5 = por %p108_p2, %p107_p0  ;;  %p1320_p6 = por %p1572_p4, %p113_p3 }
  0x10   : > { %1576 = sst [smem:[#allocation16_spill]] %s1312_s30  ;;  %p158_p7 = scmp.eq.s32.totalorder %s1296_s25, 1 }
  0x11   : > { %s1578_s8 = scalar_select %p1320_p6, 1, 0 }
  0x12   : > { %p164_p8 = scmp.eq.s32.totalorder %s866_s26, 1  ;;  %p867_p9 = scmp.ge.s32.totalorder %s1229_s24, 1 }
  0x13   : > { %p197_p10 = scmp.lt.s32.totalorder %s1229_s24, 3  ;;  %p1327_p11 = por %p158_p7, %p107_p0 }
  0x14   : > { %p1331_p12 = por %p164_p8, %p113_p3  ;;  %s1231_s12 = smov [#allocation2]  }
  0x15   : > { %s1579_s9 = scalar_select %p1327_p11, 1, 0 }
  0x16   : > { %s1580_s10 = scalar_select %p1331_p12, 1, 0 }
  0x17   : > { %p1335_p13 = pnand %p867_p9, %p197_p10  ;;  %s209_s13 = sshll.u32 %s1231_s12, 4  ;;  %s210_s13 = int_to_ptr.vmem [resolvable:$true] %s209_s13 }
  0x18   : > { %p997_p3 = scmp.lt.s32.totalorder %s1229_s24, 2  ;;  %s1232_s15 = smov [#allocation5]  }
  0x19   : > { %s1581_s11 = scalar_select %p1335_p13, 1, 0 }
  0x1a   : > { %p977_p1 = pneg %p1335_p13  ;;  %s222_s16 = sshll.u32 %s1232_s15, 4  ;;  %s223_s16 = int_to_ptr.vmem [resolvable:$true] %s222_s16 }
  0x1b   : > { %s1058_s17 = scalar_lea.vmem %s210_s13, 256  ;;  %p1066_p12 = scmp.lt.s32.totalorder %s210_s13, %s210_s13 }
  0x1c   : > { %p1343_p2 = pnand %p977_p1, %p1572_p4  ;;  %p1059_p8 = scmp.ne.s32.totalorder %s210_s13, %s1058_s17 }
  0x1d   : > { %p1067_p11 = scmp.lt.s32.totalorder %s1058_s17, %s1058_s17 }
  0x1e   : > { %p1049_p7 = pneg %p1343_p2 }
  0x1f   : > { %p1068_p1 = por %p1067_p11, %p1066_p12 }
  0x20   : > { %p1061_p9 = pnand %p1059_p8, %p1049_p7 }
  0x22   : > { %p1062_p10 = pneg %p1061_p9 }
  0x24   : > { %p1069_p4 = pnand %p1068_p1, %p1062_p10 }
  0x26   : > { %1072 = shalt.err (!%p1069_p4)
}
  0x27   : > { %s1233_s18 = smov 64   ;;  %s1234_s19 = smov 4  }
  0x28   : > { %s1583_s0 = sld [smem:[#allocation17_spill]]  ;;  %p1366_p8 = pnand %p997_p3, %p1314_p5 }
  0x29   : > { %s1084_s29 = scalar_lea.vmem %s223_s16, 256  ;;  %p1092_p9 = scmp.lt.s32.totalorder %s223_s16, %s223_s16 }
  0x2a   : > { %p1085_p4 = scmp.ne.s32.totalorder %s223_s16, %s1084_s29  ;;  %p1093_p10 = scmp.lt.s32.totalorder %s1084_s29, %s1084_s29 }
  0x2c   : > { %p1087_p11 = pnand %p1085_p4, %p1049_p7  ;;  %p1094_p1 = por %p1093_p10, %p1092_p9 }
  0x2e   : > { %980 = dma.hbm_to_vmem [thread:$0]  (!%p1343_p2), %s1583_s0, 256, %s210_s13, [#allocation3], %s1233_s18, %s1233_s18, %s1234_s19  }
  0x2f   : > { %p1088_p12 = pneg %p1087_p11 }
  0x31   : > { %p1095_p0 = pnand %p1094_p1, %p1088_p12 }
  0x33   : > { %1098 = shalt.err (!%p1095_p0)
}
  0x34   : > { %983 = dma.hbm_to_vmem [thread:$0]  (!%p1343_p2), %s1566_s2, 256, %s223_s16, [#allocation6], %s1233_s18, %s1233_s18, %s1234_s19  }
  0x35   : > { %s249_s13 = sand.u32 1, %s1229_s24   ;;  %s251_s15 = sand.u32 1, %s1225_s23  }
  0x36   : > { %s871_s17 = sshll.u32 %s251_s15, 4  ;;  %s905_s20 = sshll.u32 %s1229_s24, 8 }
  0x37   : > { %s1387_s0 = scalar_lea.hbm %s1567_s3, %s905_s20  ;;  %s253_s14 = scalar_lea.vmem [#allocation7], %s871_s17 }
  0x38   : > { %s261_s30 = sshll.u32 %s253_s14, 4  ;;  %s1391_s7 = scalar_lea.sflag [#allocation3], %s249_s13  ;;  %s1389_s30 = int_to_ptr.vmem [resolvable:$true] %s261_s30 }
  0x39   : > { %s1099_s12 = scalar_lea.hbm %s1387_s0, 256  ;;  %p1101_p2 = pneg %p1366_p8 }
  0x3a   : > { %p1100_p5 = scmp.ne.s32.totalorder %s1387_s0, %s1099_s12  ;;  %s1104_s20 = scalar_lea.hbm %s1567_s3, 512 }
  0x3b   : > { %p1105_p7 = scmp.lt.s32.totalorder %s1387_s0, %s1567_s3  ;;  %p1106_p4 = scmp.lt.s32.totalorder %s1104_s20, %s1099_s12 }
  0x3c   : > { %p1102_p0 = pnand %p1101_p2, %p1100_p5 }
  0x3d   : > { %p1107_p11 = por %p1106_p4, %p1105_p7 }
  0x3e   : > { %p1103_p3 = pneg %p1102_p0 }
  0x40   : > { %p1108_p12 = pnand %p1107_p11, %p1103_p3 }
  0x42   : > { %1111 = shalt.err (!%p1108_p12)
}
  0x43   : > { %s1112_s13 = scalar_lea.vmem %s1389_s30, 256  ;;  %s1235_s17 = smov [#allocation7]  }
  0x44   : > { %p1113_p9 = scmp.ne.s32.totalorder %s1389_s30, %s1112_s13  ;;  %s1117_s14 = sshll.u32 %s1235_s17, 4  ;;  %s1118_s14 = int_to_ptr.vmem [resolvable:$false] %s1117_s14 }
  0x45   : > { %s1119_s16 = scalar_lea.vmem %s1118_s14, 512  ;;  %p1120_p5 = scmp.lt.s32.totalorder %s1389_s30, %s1118_s14 }
  0x46   : > { %p1115_p10 = pnand %p1113_p9, %p1101_p2  ;;  %p1121_p0 = scmp.lt.s32.totalorder %s1119_s16, %s1112_s13 }
  0x48   : > { %p1116_p1 = pneg %p1115_p10  ;;  %p1122_p6 = por %p1121_p0, %p1120_p5 }
  0x4a   : > { %p1123_p13 = pnand %p1122_p6, %p1116_p1 }
  0x4c   : > { %1126 = shalt.err (!%p1123_p13)
}
  0x4d   : > { %987 = dma.hbm_to_vmem [thread:$0]  (!%p1366_p8), %s1387_s0, 256, %s1389_s30, %s1391_s7, %s1233_s18, %s1233_s18, %s1234_s19  }
  0x4e   : > { %p1585_p2 = scmp.ne.s32.totalorder %s1581_s11, 0 }
  0x4f   : > { %p1586_p3 = scmp.eq.s32.totalorder (!%p1585_p2), %s1296_s25, 0 }
  0x50   : > { %273 = sbr.rel (%p1585_p2) target bundleno = 548 (0x224), region = 40 }
  0x55   : > { %1196 = dma.done.wait (%p1586_p3), [#allocation3], 256   ;;  %p1587_p7 = pmov %p1586_p3 }
  0x56   : > { %p1588_p6 = pmov %p1586_p3 }
  0x57   : > { %1198 = vsyncadd (%p1587_p7), [#allocation3], 4294967040 }
  0x58   : > { %1200 = dma.done.wait (%p1588_p6), [#allocation6], 256   ;;  %p1589_p13 = pmov %p1586_p3 }
  0x59   : > { %s283_s28 = sand.u32 1, %s1296_s25   ;;  %s1427_s0 = sand.u32 1, %s1221_s22  }
  0x5a   : > { %1202 = vsyncadd (%p1589_p13), [#allocation6], 4294967040  ;;  %s878_s30 = sshll.u32 %s1427_s0, 4  ;;  %s284_s11 = scalar_lea.sflag [#allocation3], %s283_s28 }
  0x5b   : > { %s287_s18 = scalar_lea.vmem [#allocation7], %s878_s30  ;;  %p1590_p8 = scmp.ne.s32.totalorder %s1578_s8, 0 }
  0x5d   : > { %1204 = dma.done.wait (%p1590_p8), %s284_s11, 256  }
  0x5e   : > { %1206 = vsyncadd (%p1590_p8), %s284_s11, 4294967040  ;;  %s881_s19 = sshll.u32 %s1296_s25, 1  ;;  %v1039_v0 = vld [vmem:[#allocation2 + $0x8] sm:$0xff]   ;;  %v1040_v1 = vld [vmem:[#allocation2] sm:$0xff]   ;;  %vm370_vm0 = vcmask 261120   ;;  %v1236_v8 = vmov 0.0  }
  0x5f   : > { %p328_p4 = scmp.lt.s32.totalorder %s881_s19, 3  ;;  %925 = vmatprep.subr.bf16.mxu0 %v1039_v0  ;;  %v1043_v3 = vld [vmem:[#allocation5 + $0x8] sm:$0xff]   ;;  %v1045_v5 = vld [vmem:[%s287_s18] sm:$0xff]   ;;  %933 = vmatprep.subr.mxu1 %v1236_v8  ;;  %v337_v11 = vld [vmem:[%s1568_s4 + $0x8] sm:$0xff]  ;;  %vm1237_vm1 = vmmov 0   ;;  %vm446_vm2 = vcmask 1041409  }
  0x60   : > { %926 = vmatpush3.bf16.msra.mxu0 %v1039_v0  ;;  %v1044_v6 = vld [vmem:[#allocation5] sm:$0xff]   ;;  %v1046_v7 = vld [vmem:[%s287_s18 + $0x8] sm:$0xff]   ;;  %v336_v12 = vld [vmem:[%s1568_s4] sm:$0xff]  ;;  %941 = vmatprep.mubr.msk.f32.mxu1 %vm1237_vm1, %v1236_v8  ;;  %s879_s30 = sshll.u32 %s1427_s0, 1  ;;  %s900_s11 = sshll.u32 %s1296_s25, 5  ;;  %vm520_vm3 = vcmask 25600  }
  0x61   : > { %s1600_s19 = smov (!%p328_p4, %s881_s19), 3  ;;  %927 = vmatprep.subr.bf16.mxu0 %v1040_v1  ;;  %v339_v9 = vld [vmem:[%s1568_s4 + $0x18] sm:$0xff]  ;;  %v338_v10 = vld [vmem:[%s1568_s4 + $0x10] sm:$0xff]  ;;  %s319_s18 = scalar_lea.vmem [#allocation8], %s879_s30 }
  0x62   : > { %s906_s7 = sshll.u32 %s1600_s19, 3  ;;  %934 = vmatpush3.msra.mxu1 %v339_v9  ;;  %s720_s19 = sshll.u32 %s319_s18, 4  ;;  %s1489_s19 = int_to_ptr.vmem [resolvable:$true] %s720_s19 }
  0x63   : > { %s332_s20 = scalar_lea.vmem %s1565_s1, %s906_s7  ;;  %935 = vmatprep.subr.mxu1 %v1236_v8  ;;  %s1487_s15 = scalar_lea.hbm %s1569_s5, %s900_s11 }
  0x64   : > { %v1041_v2 = vld [vmem:[%s332_s20] sm:$0xff]   ;;  %v1042_v4 = vld [vmem:[%s332_s20 + $0x8] sm:$0xff]   ;;  %928 = vmatpush3.bf16.msra.mxu0 %v1040_v1  ;;  %936 = vmatpush3.msra.mxu1 %v338_v10  ;;  %s702_s20 = scalar_lea.sflag [#allocation4], %s1427_s0  ;;  %s1127_s8 = scalar_lea.vmem %s1489_s19, 32 }
  0x65   : > { %929 = vmatprep.mubr.msk.bf16.mxu0 %vm370_vm0, %v1041_v2  ;;  %944 = vmatprep.subr.bf16.mxu0 %v1043_v3  ;;  %p1128_p11 = scmp.ne.s32.totalorder %s1489_s19, %s1127_s8  ;;  %p1591_p12 = scmp.ne.s32.totalorder %s1579_s9, 0 }
  0x66   : > { %937 = vmatprep.subr.mxu1 %v1236_v8  ;;  %s1238_s26 = smov [#allocation8]  }
  0x67   : > { %930 = vmatmul.mubr.msk.bf16.vlgmr.msra.gmra.mxu0 %vm370_vm0, %v1042_v4  ;;  %938 = vmatpush3.msra.mxu1 %v337_v11  ;;  %p1129_p9 = pnand %p1128_p11, %p1591_p12  ;;  %s1131_s29 = sshll.u32 %s1238_s26, 4  ;;  %s1132_s29 = int_to_ptr.vmem [resolvable:$false] %s1131_s29 }
  0x68   : > { %945 = vmatpush3.bf16.msra.mxu0 %v1043_v3  ;;  %948 = vmatprep.mubr.msk.bf16.mxu0 %vm370_vm0, %v1045_v5  ;;  %s1133_s13 = scalar_lea.vmem %s1132_s29, 64  ;;  %p1134_p1 = scmp.lt.s32.totalorder %s1489_s19, %s1132_s29 }
  0x69   : > { %946 = vmatprep.subr.bf16.mxu0 %v1044_v6  ;;  %939 = vmatprep.subr.mxu1 %v1236_v8  ;;  %p1130_p10 = pneg %p1129_p9  ;;  %p1135_p5 = scmp.lt.s32.totalorder %s1133_s13, %s1127_s8 }
  0x6a   : > { %940 = vmatpush3.msra.mxu1 %v336_v12 }
  0x6b   : > { %952 = vmatprep.subr.mxu1 %v1236_v8  ;;  %p1136_p0 = por %p1135_p5, %p1134_p1 }
  0x6c   : > { %947 = vmatpush3.bf16.msra.mxu0 %v1044_v6 }
  0x6d   : > { %p1137_p2 = pnand %p1136_p0, %p1130_p10 }
  0x6f   : > { %949 = vmatmul.mubr.msk.bf16.vlgmr.msra.gmra.mxu0 %vm370_vm0, %v1046_v7 }
 0x127   : > { %v931_v13 = vpop.f32.mrf.mxu0 }
 0x128   : > { %v435_v16 = vsel %vm370_vm0, %v931_v13, -inf }
 0x129   : > { %v411_v14 = vpop.f32.mrf.mxu0 }
 0x12a   : > { %v426_v20 = vsel %vm370_vm0, %v411_v14, -inf }
 0x12b   : > { %v932_v15 = vpop.f32.mrf.mxu0 }
 0x12c   : > { %v436_v17 = vsel %vm370_vm0, %v932_v15, -inf }
 0x12d   : > { %v437_v18 = vmax.f32 %v435_v16, %v436_v17  ;;  %v414_v19 = vpop.f32.mrf.mxu0 }
 0x12e   : > { %v427_v21 = vsel %vm370_vm0, %v414_v19, -inf }
 0x12f   : > { %v438_v22 = vrot.slane %v437_v18, 4  ;;  %v428_v23 = vmax.f32 %v426_v20, %v427_v21  ;;  %v950_v24 = vpop.f32.mrf.mxu0 }
 0x130   : > { %v616_v31 = vsel %vm370_vm0, %v950_v24, -inf }
 0x131   : > { %v439_v25 = vmax.f32 %v437_v18, %v438_v22  ;;  %v429_v26 = vrot.slane %v428_v23, 4  ;;  %v592_v27 = vpop.f32.mrf.mxu0 }
 0x132   : > { %v607_v37 = vsel %vm370_vm0, %v592_v27, -inf }
 0x133   : > { %v440_v28 = vrot.slane %v439_v25, 2  ;;  %v430_v29 = vmax.f32 %v428_v23, %v429_v26  ;;  %v951_v30 = vpop.f32.mrf.mxu0 }
 0x134   : > { %v617_v32 = vsel %vm370_vm0, %v951_v30, -inf }
 0x135   : > { %v441_v33 = vmax.f32 %v439_v25, %v440_v28  ;;  %v431_v34 = vrot.slane %v430_v29, 2  ;;  %v618_v35 = vmax.f32 %v616_v31, %v617_v32  ;;  %v595_v36 = vpop.f32.mrf.mxu0 }
 0x136   : > { %v608_v38 = vsel %vm370_vm0, %v595_v36, -inf }
 0x137   : > { %v442_v39 = vrot.slane %v441_v33, 1  ;;  %v432_v40 = vmax.f32 %v430_v29, %v431_v34  ;;  %v619_v41 = vrot.slane %v618_v35, 4  ;;  %v609_v42 = vmax.f32 %v607_v37, %v608_v38 }
 0x139   : > { %v433_v43 = vrot.slane %v432_v40, 1  ;;  %v620_v44 = vmax.f32 %v618_v35, %v619_v41  ;;  %v610_v45 = vrot.slane %v609_v42, 4  ;;  %v443_v46 = vmax.f32 %v441_v33, %v442_v39 }
 0x13b   : > { %v434_v47 = vmax.f32 %v432_v40, %v433_v43  ;;  %v621_v48 = vrot.slane %v620_v44, 2  ;;  %v611_v49 = vmax.f32 %v609_v42, %v610_v45 }
 0x13d   : > { %v622_v50 = vmax.f32 %v620_v44, %v621_v48  ;;  %v612_v51 = vrot.slane %v611_v49, 2  ;;  %v447_v52 = vsel %vm446_vm2, %v443_v46, %v434_v47 }
 0x13e   : > { %942 = vmatmul.mubr.msk.f32.vlgmr.msra.gmra.mxu1 %vm370_vm0, %v447_v52 }
 0x13f   : > { %v623_v53 = vrot.slane %v622_v50, 1  ;;  %v613_v54 = vmax.f32 %v611_v49, %v612_v51  ;;  %953 = vmatpush3.msra.mxu1 %v339_v9  ;;  %960 = vmatprep.mubr.msk.f32.mxu1 %vm1237_vm1, %v1236_v8 }
 0x140   : > { %954 = vmatprep.subr.mxu1 %v1236_v8 }
 0x141   : > { %v614_v55 = vrot.slane %v613_v54, 1  ;;  %955 = vmatpush3.msra.mxu1 %v338_v10  ;;  %v624_v56 = vmax.f32 %v622_v50, %v623_v53 }
 0x142   : > { %956 = vmatprep.subr.mxu1 %v1236_v8 }
 0x143   : > { %v615_v57 = vmax.f32 %v613_v54, %v614_v55  ;;  %957 = vmatpush3.msra.mxu1 %v337_v11 }
 0x144   : > { %958 = vmatprep.subr.mxu1 %v1236_v8 }
 0x145   : > { %959 = vmatpush3.msra.mxu1 %v336_v12  ;;  %v627_v58 = vsel %vm446_vm2, %v624_v56, %v615_v57 }
 0x146   : > { %961 = vmatmul.mubr.msk.f32.vlgmr.msra.gmra.mxu1 %vm370_vm0, %v627_v58 }
 0x1fe   : > { %v516_v59 = vpop.f32.mrf.mxu1 }
 0x1ff   : > { %521 = vst.msk [vmem:[%s319_s18] sm:$0x3] %vm520_vm3, %v516_v59 }
 0x200   : > { %v943_v60 = vpop.f32.mrf.mxu1 }
 0x201   : > { %1140 = shalt.err (!%p1137_p2)
}
 0x202   : > { %s1141_s17 = scalar_lea.hbm %s1487_s15, 32  ;;  %s1145_s28 = scalar_lea.hbm %s1569_s5, 64 }
 0x203   : > { %p1142_p3 = scmp.ne.s32.totalorder %s1487_s15, %s1141_s17  ;;  %p1146_p13 = scmp.lt.s32.totalorder %s1487_s15, %s1569_s5 }
 0x204   : > { %p1147_p8 = scmp.lt.s32.totalorder %s1145_s28, %s1141_s17 }
 0x205   : > { %p1143_p7 = pnand %p1142_p3, %p1591_p12 }
 0x206   : > { %p1148_p4 = por %p1147_p8, %p1146_p13 }
 0x207   : > { %p1144_p6 = pneg %p1143_p7 }
 0x209   : > { %p1149_p11 = pnand %p1148_p4, %p1144_p6 }
 0x20b   : > { %1152 = shalt.err (!%p1149_p11)
}
 0x20c   : > { %973 = dma.vmem_to_hbm [thread:$0]  (%p1591_p12), %s1489_s19, 32, %s1487_s15, %s702_s20   ;;  %v696_v61 = vpop.f32.mrf.mxu1 }
 0x20d   : > { %s326_s12 = scalar_lea.vmem [#allocation9], %s879_s30  ;;  %s1520_s13 = scalar_lea.hbm %s1570_s6, %s900_s11 }
 0x20e   : > { %s733_s8 = sshll.u32 %s326_s12, 4  ;;  %700 = vst.msk [vmem:[%s326_s12] sm:$0x3] %vm520_vm3, %v696_v61  ;;  %v962_v62 = vpop.f32.mrf.mxu1  ;;  %s707_s17 = scalar_lea.sflag [#allocation10], %s1427_s0  ;;  %s1522_s8 = int_to_ptr.vmem [resolvable:$true] %s733_s8 }
 0x20f   : > { %s1153_s19 = scalar_lea.vmem %s1522_s8, 32  ;;  %s1239_s25 = smov [#allocation9]  }
 0x210   : > { %p1154_p9 = scmp.ne.s32.totalorder %s1522_s8, %s1153_s19  ;;  %s1157_s30 = sshll.u32 %s1239_s25, 4  ;;  %s1158_s30 = int_to_ptr.vmem [resolvable:$false] %s1157_s30 }
 0x211   : > { %s1159_s11 = scalar_lea.vmem %s1158_s30, 64  ;;  %p1160_p5 = scmp.lt.s32.totalorder %s1522_s8, %s1158_s30 }
 0x212   : > { %p1155_p10 = pnand %p1154_p9, %p1591_p12  ;;  %p1161_p0 = scmp.lt.s32.totalorder %s1159_s11, %s1153_s19 }
 0x214   : > { %p1156_p1 = pneg %p1155_p10  ;;  %p1162_p2 = por %p1161_p0, %p1160_p5 }
 0x216   : > { %p1163_p3 = pnand %p1162_p2, %p1156_p1 }
 0x218   : > { %1166 = shalt.err (!%p1163_p3)
}
 0x219   : > { %s1167_s15 = scalar_lea.hbm %s1520_s13, 32  ;;  %s1171_s14 = scalar_lea.hbm %s1570_s6, 64 }
 0x21a   : > { %p1168_p7 = scmp.ne.s32.totalorder %s1520_s13, %s1167_s15  ;;  %p1172_p8 = scmp.lt.s32.totalorder %s1520_s13, %s1570_s6 }
 0x21b   : > { %p1173_p4 = scmp.lt.s32.totalorder %s1171_s14, %s1167_s15 }
 0x21c   : > { %p1169_p6 = pnand %p1168_p7, %p1591_p12 }
 0x21d   : > { %p1174_p11 = por %p1173_p4, %p1172_p8 }
 0x21e   : > { %p1170_p13 = pneg %p1169_p6 }
 0x220   : > { %p1175_p9 = pnand %p1174_p11, %p1170_p13 }
 0x222   : > { %1178 = shalt.err (!%p1175_p9)
}
 0x223   : > { %974 = dma.vmem_to_hbm [thread:$0]  (%p1591_p12), %s1522_s8, 32, %s1520_s13, %s707_s17  }
 0x224 PF: > { %s745_s18 = sand.u32 1, %s1217_s21   ;;  %p1592_p10 = scmp.ne.s32.totalorder %s1580_s10, 0 }
 0x225   : > { %p1593_p1 = scmp.ge.s32.totalorder %s1229_s24, 2  ;;  %s746_s7 = scalar_lea.sflag [#allocation4], %s745_s18 }
 0x227   : > { %p989_p5 = pnand %p1593_p1, %p1592_p10 }
 0x229   : > { %p990_p0 = pneg %p989_p5 }
 0x22b   : > { %1208 = dma.done.wait (%p990_p0), %s746_s7, 32  }
 0x22c   : > { %1210 = vsyncadd (%p990_p0), %s746_s7, 4294967264  ;;  %s755_s12 = scalar_lea.sflag [#allocation10], %s745_s18 }
 0x22d   : > { %1212 = dma.done.wait (%p990_p0), %s755_s12, 32  }
 0x22e   : > { %1214 = vsyncadd (%p990_p0), %s755_s12, 4294967264  ;;  %s1594_s9 = sld [smem:[#allocation16_spill]]  ;;  %p22_p12 = scmp.ge.s32.totalorder %s1300_s27, 4  }
 0x22f   : > { %s1595_s21 = smov %s1221_s22  ;;  %s1596_s22 = smov %s1225_s23 }
 0x230   : > { %s1598_s24 = smov %s1300_s27  ;;  %24 = sbr.rel (!%p22_p12) target bundleno = 9 (0x9), region = 112 }
 0x234   : > { %s1597_s23 = smov %s1594_s9 }
 0x235   :  { %760 = vsyncpa [#allocation3], 1 }
 0x236   :  { %762 = vsyncpa [#allocation3 + $0x1], 1 }
 0x237   :  { %763 = vsyncpa [#allocation6], 1 }
 0x238   :  { %764 = vsyncpa [#allocation4], 1 }
 0x239   :  { %766 = vsyncpa [#allocation4 + $0x1], 1 }
 0x23a   :  { %767 = vsyncpa [#allocation10], 1 }
 0x23b   :  { %769 = vsyncpa [#allocation10 + $0x1], 1 }

</bundles_post_ra>
